<compile_context>
chip_gen: v7x
topology: tpu7x:2x2x1
jax: 0.10.0
libtpu: 0.0.40
codegen_flags: <defaults>
</compile_context>

<pallas_src>
import jax
import jax.numpy as jnp
from jax.experimental import pallas as pl
from jax.experimental.pallas import tpu as pltpu


def _prosody_kernel(x_ref, vb_ref,
                    wtt_ref, w2_ref, b2_ref,
                    whT_ref, bhT_ref,
                    pros_ref, head_ref):
    # x_ref:   (tt, text_dim)  compute dtype (bf16 or f32)
    # vb_ref:  (1, H)  f32     per-batch bias = v@wv@w1[H:] + b1 + bt@w1[:H]
    # wtt_ref: (text_dim, H)   folded weight  wt @ w1[:H]
    x = x_ref[...]

    # Folded text_proj + prosody_net layer 1 (f32 accumulation on the MXU).
    h1 = jnp.dot(x, wtt_ref[...], preferred_element_type=jnp.float32) + vb_ref[...]
    h1 = jnp.maximum(h1, 0.0)          # ReLU; Dropout is identity at inference

    # prosody_net layer 2.
    h2 = (jnp.dot(h1.astype(w2_ref.dtype), w2_ref[...],
                  preferred_element_type=jnp.float32)
          + b2_ref[...])
    h2 = jnp.maximum(h2, 0.0)          # ReLU; Dropout is identity at inference

    pros_ref[...] = h2.astype(pros_ref.dtype)

    # Fused heads computed transposed -> (3, tt) lane-dense store.
    # whT_ref: (3, H2); contract H2 of both operands.
    heads = jax.lax.dot_general(
        whT_ref[...], h2.astype(whT_ref.dtype),
        dimension_numbers=(((1,), (1,)), ((), ())),
        preferred_element_type=jnp.float32) + bhT_ref[...]        # (3, tt)

    # Row 0: f0, row 1: energy, row 2: sigmoid(duration).  Row-mask select so
    # we issue a single full (3, tt) store.
    row = jax.lax.broadcasted_iota(jnp.int32, heads.shape, 0)
    heads = jnp.where(row == 2, jax.nn.sigmoid(heads), heads)
    head_ref[...] = heads.astype(head_ref.dtype)


def _round_up(n, m):
    return ((n + m - 1) // m) * m


def kokoro_prosody_predictor(text_features, voice_embedding, params, *,
                             max_seq_tile=512,
                             compute_dtype=jnp.bfloat16):
    """Fused forward pass.  Returns the same dict as the PyTorch module."""
    assert max_seq_tile % 128 == 0, "max_seq_tile must be a multiple of 128"
    B, T, text_dim = text_features.shape
    if voice_embedding.ndim == 1:
        voice_embedding = voice_embedding[None, :]
    H = params["wt"].shape[1]
    H2 = params["w2"].shape[1]

    f32 = jnp.float32
    cd = compute_dtype
    hp = jax.lax.Precision.HIGHEST      # keep the host-side folds exact in f32

    # ---- host-side algebraic folds (all in f32, cast to bf16 only at the end)
    w1 = params["w1"].astype(f32)                           # (2H, H)
    w1_text, w1_voice = w1[:H], w1[H:]
    wtt = jnp.dot(params["wt"].astype(f32), w1_text, precision=hp)   # (text_dim, H)
    v_proj = (jnp.dot(voice_embedding.astype(f32), params["wv"].astype(f32),
                      precision=hp) + params["bv"])                   # (B, H)
    v_bias = (jnp.dot(v_proj, w1_voice, precision=hp)
              + params["b1"]
              + jnp.dot(params["bt"].astype(f32), w1_text, precision=hp))  # (B, H)
    v_bias = jnp.broadcast_to(v_bias, (B, H)).reshape(B, 1, H)        # tiny

    # Fuse the three heads into one (3, H2) weight / (3, 1) bias.
    wheadT = jnp.concatenate(
        [params["wf0"], params["wen"], params["wdu"]], axis=1).T       # (3, H2)
    bheadT = jnp.concatenate(
        [params["bf0"], params["ben"], params["bdu"]], axis=1).T       # (3, 1)

    # ---- tiling: batch is its own grid axis, T is tiled (pad only the tail)
    if T > max_seq_tile:
        tt = max_seq_tile                                   # multiple of 128
        Tpad = _round_up(T, tt)
    else:
        tt = T                                              # single tile, no pad
        Tpad = T
    x = text_features
    if Tpad != T:
        x = jnp.pad(x, ((0, 0), (0, Tpad - T), (0, 0)))

    grid = (B, Tpad // tt)

    args = (
        x.astype(cd),                   # (B, Tpad, text_dim)
        v_bias.astype(f32),             # (B, 1, H)  per-batch bias
        wtt.astype(cd),                 # (text_dim, H)
        params["w2"].astype(cd),        # (H, H2)
        params["b2"].astype(f32),       # (1, H2)
        wheadT.astype(cd),              # (3, H2)
        bheadT.astype(f32),             # (3, 1)
    )

    def const_spec(a):
        nd = a.ndim
        # Constant weights/biases: same (0, ..) block for every grid step.
        return pl.BlockSpec(a.shape, lambda b, t, _nd=nd: (0,) * _nd)

    in_specs = [
        pl.BlockSpec((None, tt, text_dim), lambda b, t: (b, t, 0)),   # tokens
        pl.BlockSpec((None, 1, H), lambda b, t: (b, 0, 0)),           # voice bias
    ] + [const_spec(a) for a in args[2:]]

    out_specs = [
        pl.BlockSpec((None, tt, H2), lambda b, t: (b, t, 0)),  # prosody_features
        pl.BlockSpec((None, 3, tt), lambda b, t: (b, 0, t)),   # fused heads, lane-dense
    ]
    out_shape = [
        jax.ShapeDtypeStruct((B, Tpad, H2), f32),
        jax.ShapeDtypeStruct((B, 3, Tpad), f32),
    ]

    # VMEM guard: only set an explicit limit if a scaled-up model would exceed
    # the 32 MiB scoped default (v7x has 64 MiB physical).
    isz = jnp.dtype(cd).itemsize
    vmem_est = (
        2 * tt * text_dim * isz                                # token tiles (dbuf)
        + 2 * (tt * H2 + 3 * tt) * 4                           # output tiles (dbuf)
        + 2 * H * 4                                            # voice-bias block
        + 2 * ((text_dim * H + H * H2 + 3 * H2) * isz + (H2 + 3) * 4)  # constants
    )
    ckwargs = dict(dimension_semantics=("parallel", "parallel"))
    if vmem_est > (24 << 20):
        ckwargs["vmem_limit_bytes"] = min(int(vmem_est * 3 // 2), 128 << 20)

    pros, heads = pl.pallas_call(
        _prosody_kernel,
        out_shape=out_shape,
        grid_spec=pltpu.PrefetchScalarGridSpec(
            num_scalar_prefetch=0,
            grid=grid,
            in_specs=in_specs,
            out_specs=out_specs,
        ),
        compiler_params=pltpu.CompilerParams(**ckwargs),
    )(*args)

    pros = pros[:, :T]                  # (B, T, H2)
    heads = heads[:, :, :T]             # (B, 3, T)
    return {
        "f0": heads[:, 0],
        "energy": heads[:, 1],
        "duration": heads[:, 2],
        "prosody_features": pros,
    }


def init_params(key, text_dim, voice_dim, hidden_dim):
    H, H2 = hidden_dim, hidden_dim // 2
    ks = jax.random.split(key, 14)
    s = 0.05

    def w(k, shape):
        return (s * jax.random.normal(k, shape)).astype(jnp.float32)

    return {
        "wt":  w(ks[0], (text_dim, H)),  "bt":  w(ks[1], (1, H)),
        "wv":  w(ks[2], (voice_dim, H)), "bv":  w(ks[3], (1, H)),
        "w1":  w(ks[4], (2 * H, H)),     "b1":  w(ks[5], (1, H)),
        "w2":  w(ks[6], (H, H2)),        "b2":  w(ks[7], (1, H2)),
        "wf0": w(ks[8], (H2, 1)),        "bf0": w(ks[9], (1, 1)),
        "wen": w(ks[10], (H2, 1)),       "ben": w(ks[11], (1, 1)),
        "wdu": w(ks[12], (H2, 1)),       "bdu": w(ks[13], (1, 1)),
    }


def reference_forward(text_features, voice_embedding, p):
    t = text_features @ p["wt"] + p["bt"]
    v = voice_embedding @ p["wv"] + p["bv"]               # (B, H)
    v = jnp.broadcast_to(v[:, None, :], t.shape)
    comb = jnp.concatenate([t, v], axis=-1)
    h1 = jax.nn.relu(comb @ p["w1"] + p["b1"])
    h2 = jax.nn.relu(h1 @ p["w2"] + p["b2"])
    return {
        "f0": (h2 @ p["wf0"] + p["bf0"])[..., 0],
        "energy": (h2 @ p["wen"] + p["ben"])[..., 0],
        "duration": jax.nn.sigmoid(h2 @ p["wdu"] + p["bdu"])[..., 0],
        "prosody_features": h2,
    }


if __name__ == "__main__":
    B, T = 2, 16
    text_dim, voice_dim, hidden_dim = 256, 128, 256

    key = jax.random.PRNGKey(0)
    k_text, k_voice, k_params = jax.random.split(key, 3)
    text_features = jax.random.normal(k_text, (B, T, text_dim), dtype=jnp.float32)
    voice_embedding = jax.random.normal(k_voice, (B, voice_dim), dtype=jnp.float32)
    params = init_params(k_params, text_dim, voice_dim, hidden_dim)

    ref = reference_forward(text_features, voice_embedding, params)

    names = ("f0", "energy", "duration", "prosody_features")

    # 1) f32 compute path: checks the plumbing / weight folds (tolerance covers
    #    TPU default-precision f32 matmuls in the pure-JAX reference).
    out_f32 = kokoro_prosody_predictor(text_features, voice_embedding, params,
                                       compute_dtype=jnp.float32)
    jax.block_until_ready(out_f32)
    for name in names:
        assert out_f32[name].shape == ref[name].shape, (
            name, out_f32[name].shape, ref[name].shape)
        assert jnp.allclose(out_f32[name], ref[name], atol=1e-2, rtol=1e-2), name

    # 2) default bf16 matmul-input path (f32 accumulation): looser tolerance.
    out = kokoro_prosody_predictor(text_features, voice_embedding, params)
    jax.block_until_ready(out)
    for name in names:
        assert out[name].shape == ref[name].shape, (
            name, out[name].shape, ref[name].shape)
        assert jnp.allclose(out[name], ref[name], atol=5e-2, rtol=5e-2), name

    # 3) exercise the multi-tile + tail-padded T path (tiny extra work).
    out_tiled = kokoro_prosody_predictor(text_features, voice_embedding, params,
                                         max_seq_tile=128)
    jax.block_until_ready(out_tiled)
    for name in names:
        assert jnp.allclose(out_tiled[name], ref[name], atol=5e-2, rtol=5e-2), name

    print("KERNEL_OK")
</pallas_src>

<mosaic_0001>
module attributes {stable_mosaic.version = 11 : i64} {
  func.func @_prosody_kernel(%arg0: i32, %arg1: i32, %arg2: memref<1x16x256xf32, #tpu.memory_space<vmem>>, %arg3: memref<1x1x256xf32, #tpu.memory_space<vmem>>, %arg4: memref<256x256xf32, #tpu.memory_space<vmem>>, %arg5: memref<256x128xf32, #tpu.memory_space<vmem>>, %arg6: memref<1x128xf32, #tpu.memory_space<vmem>>, %arg7: memref<3x128xf32, #tpu.memory_space<vmem>>, %arg8: memref<3x1xf32, #tpu.memory_space<vmem>>, %arg9: memref<1x16x128xf32, #tpu.memory_space<vmem>>, %arg10: memref<1x3x16xf32, #tpu.memory_space<vmem>>) attributes {dimension_semantics = [#tpu.dimension_semantics<parallel>, #tpu.dimension_semantics<parallel>], iteration_bounds = array<i64: 2, 1>, scalar_prefetch = 0 : i64, scratch_operands = 0 : i64, tpu.core_type = #tpu.core_type<tc>, window_params = [{transform_indices = @transform_0, window_bounds = array<i64: 1, 16, 256>}, {transform_indices = @transform_1, window_bounds = array<i64: 1, 1, 256>}, {pipeline_mode = #tpu.pipeline_mode<synchronous>, transform_indices = @transform_2, window_bounds = array<i64: 256, 256>}, {pipeline_mode = #tpu.pipeline_mode<synchronous>, transform_indices = @transform_3, window_bounds = array<i64: 256, 128>}, {pipeline_mode = #tpu.pipeline_mode<synchronous>, transform_indices = @transform_4, window_bounds = array<i64: 1, 128>}, {pipeline_mode = #tpu.pipeline_mode<synchronous>, transform_indices = @transform_5, window_bounds = array<i64: 3, 128>}, {pipeline_mode = #tpu.pipeline_mode<synchronous>, transform_indices = @transform_6, window_bounds = array<i64: 3, 1>}, {transform_indices = @transform_7, window_bounds = array<i64: 1, 16, 128>}, {transform_indices = @transform_8, window_bounds = array<i64: 1, 3, 16>}]} {
    %c0 = arith.constant 0 : index
    %c0_0 = arith.constant 0 : index
    %c0_1 = arith.constant 0 : index
    %0 = vector.load %arg2[%c0, %c0_0, %c0_1] : memref<1x16x256xf32, #tpu.memory_space<vmem>>, vector<1x16x256xf32>
    %1 = vector.shape_cast %0 : vector<1x16x256xf32> to vector<16x256xf32>
    %c0_2 = arith.constant 0 : index
    %c0_3 = arith.constant 0 : index
    %2 = vector.load %arg4[%c0_2, %c0_3] : memref<256x256xf32, #tpu.memory_space<vmem>>, vector<256x256xf32>
    %cst = arith.constant dense<0.000000e+00> : vector<16x256xf32>
    %3 = tpu.matmul %1, %2, %cst {dimension_numbers = #tpu.dot_dimension_numbers<[1], [0], [0], [1], [0, 0, 1, 1], [], []>} : vector<16x256xf32>, vector<256x256xf32>, vector<16x256xf32> -> vector<16x256xf32>
    %c0_4 = arith.constant 0 : index
    %c0_5 = arith.constant 0 : index
    %c0_6 = arith.constant 0 : index
    %4 = vector.load %arg3[%c0_4, %c0_5, %c0_6] : memref<1x1x256xf32, #tpu.memory_space<vmem>>, vector<1x1x256xf32>
    %5 = vector.shape_cast %4 : vector<1x1x256xf32> to vector<1x256xf32>
    %6 = vector.broadcast %5 : vector<1x256xf32> to vector<16x256xf32>
    %7 = arith.addf %3, %6 : vector<16x256xf32>
    %cst_7 = arith.constant 0.000000e+00 : f32
    %8 = vector.broadcast %cst_7 : f32 to vector<16x256xf32>
    %9 = arith.maximumf %7, %8 : vector<16x256xf32>
    %c0_8 = arith.constant 0 : index
    %c0_9 = arith.constant 0 : index
    %10 = vector.load %arg5[%c0_8, %c0_9] : memref<256x128xf32, #tpu.memory_space<vmem>>, vector<256x128xf32>
    %cst_10 = arith.constant dense<0.000000e+00> : vector<16x128xf32>
    %11 = tpu.matmul %9, %10, %cst_10 {dimension_numbers = #tpu.dot_dimension_numbers<[1], [0], [0], [1], [0, 0, 1, 1], [], []>} : vector<16x256xf32>, vector<256x128xf32>, vector<16x128xf32> -> vector<16x128xf32>
    %c0_11 = arith.constant 0 : index
    %c0_12 = arith.constant 0 : index
    %12 = vector.load %arg6[%c0_11, %c0_12] : memref<1x128xf32, #tpu.memory_space<vmem>>, vector<1x128xf32>
    %13 = vector.broadcast %12 : vector<1x128xf32> to vector<16x128xf32>
    %14 = arith.addf %11, %13 : vector<16x128xf32>
    %cst_13 = arith.constant 0.000000e+00 : f32
    %15 = vector.broadcast %cst_13 : f32 to vector<16x128xf32>
    %16 = arith.maximumf %14, %15 : vector<16x128xf32>
    %c0_14 = arith.constant 0 : index
    %c0_15 = arith.constant 0 : index
    %c0_16 = arith.constant 0 : index
    %17 = vector.load %arg9[%c0_14, %c0_15, %c0_16] : memref<1x16x128xf32, #tpu.memory_space<vmem>>, vector<1x16x128xf32>
    %18 = vector.shape_cast %17 : vector<1x16x128xf32> to vector<16x128xf32>
    %19 = vector.shape_cast %16 : vector<16x128xf32> to vector<1x16x128xf32>
    tpu.vector_store %arg9[%c0_14, %c0_15, %c0_16], %19 {strides = array<i32>} : memref<1x16x128xf32, #tpu.memory_space<vmem>>, vector<1x16x128xf32>,
    %c0_17 = arith.constant 0 : index
    %c0_18 = arith.constant 0 : index
    %20 = vector.load %arg7[%c0_17, %c0_18] : memref<3x128xf32, #tpu.memory_space<vmem>>, vector<3x128xf32>
    %cst_19 = arith.constant dense<0.000000e+00> : vector<3x16xf32>
    %21 = tpu.matmul %20, %16, %cst_19 {dimension_numbers = #tpu.dot_dimension_numbers<[1], [1], [0], [0], [0, 0, 1, 0], [], []>} : vector<3x128xf32>, vector<16x128xf32>, vector<3x16xf32> -> vector<3x16xf32>
    %c0_20 = arith.constant 0 : index
    %c0_21 = arith.constant 0 : index
    %22 = vector.load %arg8[%c0_20, %c0_21] : memref<3x1xf32, #tpu.memory_space<vmem>>, vector<3x1xf32>
    %23 = vector.broadcast %22 : vector<3x1xf32> to vector<3x16xf32>
    %24 = arith.addf %21, %23 : vector<3x16xf32>
    %25 = tpu.iota {dimensions = array<i32: 0>} : vector<3x16xi32>
    %c2_i32 = arith.constant 2 : i32
    %26 = vector.broadcast %c2_i32 : i32 to vector<3x16xi32>
    %27 = arith.cmpi eq, %25, %26 : vector<3x16xi32>
    %28 = arith.negf %24 : vector<3x16xf32>
    %29 = math.exp %28 : vector<3x16xf32>
    %cst_22 = arith.constant 1.000000e+00 : f32
    %30 = vector.broadcast %cst_22 : f32 to vector<3x16xf32>
    %31 = arith.addf %30, %29 : vector<3x16xf32>
    %32 = arith.divf %30, %31 : vector<3x16xf32>
    %33 = arith.select %27, %32, %24 : vector<3x16xi1>, vector<3x16xf32>
    %c0_23 = arith.constant 0 : index
    %c0_24 = arith.constant 0 : index
    %c0_25 = arith.constant 0 : index
    %34 = vector.load %arg10[%c0_23, %c0_24, %c0_25] : memref<1x3x16xf32, #tpu.memory_space<vmem>>, vector<1x3x16xf32>
    %35 = vector.shape_cast %34 : vector<1x3x16xf32> to vector<3x16xf32>
    %36 = vector.shape_cast %33 : vector<3x16xf32> to vector<1x3x16xf32>
    tpu.vector_store %arg10[%c0_23, %c0_24, %c0_25], %36 {strides = array<i32>} : memref<1x3x16xf32, #tpu.memory_space<vmem>>, vector<1x3x16xf32>,
    return
  }
  func.func @transform_0(%arg0: i32, %arg1: i32) -> (i32, i32, i32) {
    %c0_i32 = arith.constant 0 : i32
    %c0_i32_0 = arith.constant 0 : i32
    return %arg0, %arg1, %c0_i32 : i32, i32, i32
  }
  func.func @transform_1(%arg0: i32, %arg1: i32) -> (i32, i32, i32) {
    %c0_i32 = arith.constant 0 : i32
    %c0_i32_0 = arith.constant 0 : i32
    %c0_i32_1 = arith.constant 0 : i32
    return %arg0, %c0_i32, %c0_i32_0 : i32, i32, i32
  }
  func.func @transform_2(%arg0: i32, %arg1: i32) -> (i32, i32) {
    %c0_i32 = arith.constant 0 : i32
    %c0_i32_0 = arith.constant 0 : i32
    %c0_i32_1 = arith.constant 0 : i32
    return %c0_i32, %c0_i32_0 : i32, i32
  }
  func.func @transform_3(%arg0: i32, %arg1: i32) -> (i32, i32) {
    %c0_i32 = arith.constant 0 : i32
    %c0_i32_0 = arith.constant 0 : i32
    %c0_i32_1 = arith.constant 0 : i32
    return %c0_i32, %c0_i32_0 : i32, i32
  }
  func.func @transform_4(%arg0: i32, %arg1: i32) -> (i32, i32) {
    %c0_i32 = arith.constant 0 : i32
    %c0_i32_0 = arith.constant 0 : i32
    %c0_i32_1 = arith.constant 0 : i32
    return %c0_i32, %c0_i32_0 : i32, i32
  }
  func.func @transform_5(%arg0: i32, %arg1: i32) -> (i32, i32) {
    %c0_i32 = arith.constant 0 : i32
    %c0_i32_0 = arith.constant 0 : i32
    %c0_i32_1 = arith.constant 0 : i32
    return %c0_i32, %c0_i32_0 : i32, i32
  }
  func.func @transform_6(%arg0: i32, %arg1: i32) -> (i32, i32) {
    %c0_i32 = arith.constant 0 : i32
    %c0_i32_0 = arith.constant 0 : i32
    %c0_i32_1 = arith.constant 0 : i32
    return %c0_i32, %c0_i32_0 : i32, i32
  }
  func.func @transform_7(%arg0: i32, %arg1: i32) -> (i32, i32, i32) {
    %c0_i32 = arith.constant 0 : i32
    %c0_i32_0 = arith.constant 0 : i32
    return %arg0, %arg1, %c0_i32 : i32, i32, i32
  }
  func.func @transform_8(%arg0: i32, %arg1: i32) -> (i32, i32, i32) {
    %c0_i32 = arith.constant 0 : i32
    %c0_i32_0 = arith.constant 0 : i32
    return %arg0, %c0_i32, %arg1 : i32, i32, i32
  }
}

</mosaic_0001>

<bundles_post_ra>
// kernel: tpu_custom_call.1
= control target key start
LH: loop header
LB: loop body
LE: loop exit
PB: predicated region body
PF: predicated region fallthrough
CT: control target
= control target key end

     0   :  { %s1750_s0 = inlined_call_operand.hbm [shape: f32[2,16,256], index: 0, kind: input, shape index: {}]   ;;  %s1751_s1 = inlined_call_operand.vmem [shape: f32[2,1,256], index: 1, kind: input, shape index: {}]   ;;  %s1752_s2 = inlined_call_operand.hbm [shape: f32[256,256], index: 2, kind: input, shape index: {}]   ;;  %s1753_s3 = inlined_call_operand.hbm [shape: f32[256,128], index: 3, kind: input, shape index: {}]   ;;  %s1754_s4 = inlined_call_operand.vmem [shape: f32[1,128], index: 4, kind: input, shape index: {}]   ;;  %s1755_s5 = inlined_call_operand.vmem [shape: f32[3,128], index: 5, kind: input, shape index: {}]   ;;  %s1756_s6 = inlined_call_operand.vmem [shape: f32[3,1], index: 6, kind: input, shape index: {}]   ;;  %s1757_s7 = inlined_call_operand.hbm [shape: f32[2,16,128], index: 7, kind: output, shape index: {0}]   ;;  %s1758_s8 = inlined_call_operand.vmem [shape: f32[2,3,16], index: 8, kind: output, shape index: {1}]  }
   0x1   :  { %1766 = sst [smem:[#allocation14_spill]] %s1758_s8 }
   0x2   :  { %14 = vsyncpa [#allocation3], 0 }
   0x3   :  { %16 = vsyncpa [#allocation3 + $0x1], 0 }
   0x4   :  { %17 = vsyncpa [#allocation6], 0 }
   0x5   :  { %18 = vsyncpa [#allocation4], 0 }
   0x6   :  { %20 = vsyncpa [#allocation4 + $0x1], 0  ;;  %s1456_s27 = smov 0   ;;  %s1458_s28 = smov 0  }
   0x7   :  { %s1460_s29 = smov 0   ;;  %s1462_s30 = smov 0  }
   0x8   :  { %s1464_s9 = smov 0   ;;  %s1466_s10 = smov 0  }
   0x9 LB: > { %1767 = sst [smem:[#allocation12_spill]] %s1375_s27  ;;  %s953_s11 = sadd.s32 4294967295, %s1395_s10   ;;  %s1395_s10 = sphi %s1466_s10, %s26_s10   ;;  %s1391_s9 = sphi %s1464_s9, %s1790_s9   ;;  %s1387_s30 = sphi %s1462_s30, %s1789_s30   ;;  %s1383_s29 = sphi %s1460_s29, %s1788_s29   ;;  %s1379_s28 = sphi %s1458_s28, %s1787_s28   ;;  %s1375_s27 = sphi %s1456_s27, %s1786_s27  }
   0xa   : > { %s954_s12 = sadd.s32 4294967294, %s1395_s10   ;;  %p60_p0 = scmp.ne.s32.totalorder %s1379_s28, %s1375_s27 }
   0xb   : > { %p1490_p1 = scmp.eq.s32.totalorder %s953_s11, 0  ;;  %p1494_p2 = scmp.eq.s32.totalorder %s953_s11, 1 }
   0xc   : > { %p223_p3 = scmp.eq.s32.totalorder %s954_s12, 1  ;;  %p955_p5 = scmp.ge.s32.totalorder %s1395_s10, 1 }
   0xd   : > { %s1768_s13 = scalar_select %p1490_p1, 1, 0 }
   0xe   : > { %p1500_p4 = por %p1490_p1, %p60_p0  ;;  %p1505_p6 = por %p223_p3, %p60_p0 }
   0xf   : > { %p258_p7 = scmp.lt.s32.totalorder %s1395_s10, 3  ;;  %s1397_s18 = smov [#allocation5]  }
  0x10   : > { %s1770_s15 = scalar_select %p1500_p4, 1, 0 }
  0x11   : > { %s1771_s16 = scalar_select %p1505_p6, 1, 0 }
  0x12   : > { %p1510_p8 = pnand %p955_p5, %p258_p7  ;;  %s270_s19 = sshll.u32 %s1397_s18, 4  ;;  %s1514_s19 = int_to_ptr.vmem [resolvable:$true] %s270_s19 }
  0x13   : > { %1772 = sst [smem:[#allocation13_spill]] %s1771_s16  ;;  %s1398_s21 = smov [#allocation7]  }
  0x14   : > { %p1137_p9 = pneg %p1510_p8  ;;  %s283_s22 = sshll.u32 %s1398_s21, 4  ;;  %s1525_s22 = int_to_ptr.vmem [resolvable:$true] %s283_s22 }
  0x15   : > { %s1223_s25 = scalar_lea.hbm %s1752_s2, 8192 }
  0x16   : > { %p1521_p11 = pnand %p1137_p9, %p1490_p1  ;;  %p1224_p12 = scmp.ne.s32.totalorder %s1752_s2, %s1223_s25 }
  0x17   : > { %p1230_p5 = scmp.lt.u32.totalorder %s1223_s25, %s1752_s2 }
  0x18   : > { %p1225_p13 = pneg %p1521_p11 }
  0x1a   : > { %p1226_p0 = pnand %p1225_p13, %p1224_p12 }
  0x1c   : > { %p1227_p3 = pneg %p1226_p0 }
  0x1e   : > { %p1232_p7 = pnand %p1230_p5, %p1227_p3 }
  0x20   : > { %1235 = shalt.err (!%p1232_p7)
}
  0x21   : > { %s1236_s21 = scalar_lea.vmem %s1514_s19, 8192  ;;  %p1244_p1 = scmp.lt.s32.totalorder %s1514_s19, %s1514_s19 }
  0x22   : > { %p1237_p9 = scmp.ne.s32.totalorder %s1514_s19, %s1236_s21  ;;  %p1245_p12 = scmp.lt.s32.totalorder %s1236_s21, %s1236_s21 }
  0x24   : > { %p1239_p10 = pnand %p1237_p9, %p1225_p13  ;;  %p1246_p0 = por %p1245_p12, %p1244_p1 }
  0x26   : > { %p1240_p6 = pneg %p1239_p10 }
  0x28   : > { %p1247_p4 = pnand %p1246_p0, %p1240_p6 }
  0x2a   : > { %1250 = shalt.err (!%p1247_p4)
}
  0x2b   : > { %s1764_s23 = smov 256   ;;  %s1400_s24 = smov 16  }
  0x2c   : > { %1140 = dma.hbm_to_vmem [thread:$0]  (!%p1521_p11), %s1752_s2, 8192, %s1514_s19, [#allocation6], %s1764_s23, %s1764_s23, %s1400_s24  }
  0x2d   : > { %s1251_s18 = scalar_lea.hbm %s1753_s3, 4096 }
  0x2e   : > { %p1252_p1 = scmp.ne.s32.totalorder %s1753_s3, %s1251_s18  ;;  %p1258_p10 = scmp.lt.u32.totalorder %s1251_s18, %s1753_s3 }
  0x30   : > { %p1254_p4 = pnand %p1252_p1, %p1225_p13 }
  0x32   : > { %p1255_p6 = pneg %p1254_p4 }
  0x34   : > { %p1260_p3 = pnand %p1258_p10, %p1255_p6 }
  0x36   : > { %1263 = shalt.err (!%p1260_p3)
}
  0x37   : > { %s1264_s19 = scalar_lea.vmem %s1525_s22, 4096  ;;  %p1272_p12 = scmp.lt.s32.totalorder %s1525_s22, %s1525_s22 }
  0x38   : > { %p1265_p5 = scmp.ne.s32.totalorder %s1525_s22, %s1264_s19  ;;  %p1273_p0 = scmp.lt.s32.totalorder %s1264_s19, %s1264_s19 }
  0x3a   : > { %p1267_p7 = pnand %p1265_p5, %p1225_p13  ;;  %p1274_p1 = por %p1273_p0, %p1272_p12 }
  0x3c   : > { %p1268_p9 = pneg %p1267_p7 }
  0x3e   : > { %p1275_p4 = pnand %p1274_p1, %p1268_p9 }
  0x40   : > { %1278 = shalt.err (!%p1275_p4)
}
  0x41   : > { %s1401_s8 = smov 128   ;;  %s1402_s27 = smov 8  }
  0x42   : > { %1143 = dma.hbm_to_vmem [thread:$0]  (!%p1521_p11), %s1753_s3, 4096, %s1525_s22, [#allocation6], %s1401_s8, %s1401_s8, %s1402_s27  }
  0x43   : > { %s38_s26 = sadd.s32 1, %s1391_s9  ;;  %s47_s11 = sadd.s32 1, %s1383_s29 }
  0x44   : > { %p40_p13 = scmp.ge.s32.totalorder %s38_s26, 2  ;;  %p54_p6 = scmp.ne.s32.totalorder %s1383_s29, %s1379_s28 }
  0x45   : > { %p55_p10 = scmp.eq.s32.totalorder %s1395_s10, 0  ;;  %p1154_p3 = scmp.lt.s32.totalorder %s1395_s10, 2 }
  0x46   : > { %s1792_s26 = smov (%p40_p13, %s38_s26), 0  ;;  %p1592_p7 = por %p1494_p2, %p54_p6 }
  0x47   : > { %p56_p5 = por %p55_p10, %p54_p6  ;;  %s42_s20 = ssub.s32 %s1391_s9, %s1792_s26 }
  0x48   : > { %s1775_s12 = scalar_select %p1592_p7, 1, 0 }
  0x49   : > { %s306_s18 = sand.u32 1, %s1383_s29   ;;  %p45_p9 = scmp.eq.s32.totalorder %s42_s20, 0 }
  0x4a   : > { %s959_s22 = sshll.u32 %s306_s18, 5  ;;  %s976_s21 = sshll.u32 %s1391_s9, 9 }
  0x4b   : > { %s1601_s19 = scalar_select %p45_p9, %s1383_s29, %s47_s11  }
  0x4c   : > { %s1606_s16 = scalar_lea.hbm %s1750_s0, %s976_s21  ;;  %s310_s14 = scalar_lea.vmem [#allocation2], %s959_s22 }
  0x4d   : > { %s320_s25 = sshll.u32 %s310_s14, 4  ;;  %p1610_p2 = pnand %p1154_p3, %p56_p5  ;;  %s1614_s25 = int_to_ptr.vmem [resolvable:$true] %s320_s25 }
  0x4e   : > { %s1616_s11 = scalar_lea.sflag [#allocation3], %s306_s18  ;;  %s1279_s20 = scalar_lea.hbm %s1606_s16, 512 }
  0x4f   : > { %p1280_p11 = scmp.ne.s32.totalorder %s1606_s16, %s1279_s20  ;;  %p1281_p12 = pneg %p1610_p2 }
  0x50   : > { %s1284_s8 = scalar_lea.hbm %s1750_s0, 1024  ;;  %p1285_p4 = scmp.lt.u32.totalorder %s1606_s16, %s1750_s0 }
  0x51   : > { %p1282_p0 = pnand %p1281_p12, %p1280_p11  ;;  %p1286_p13 = scmp.lt.u32.totalorder %s1284_s8, %s1279_s20 }
  0x52   : > { %p1288_p10 = scmp.lt.u32.totalorder %s1279_s20, %s1606_s16 }
  0x53   : > { %p1283_p1 = pneg %p1282_p0  ;;  %p1287_p6 = por %p1286_p13, %p1285_p4 }
  0x55   : > { %p1289_p3 = por %p1288_p10, %p1287_p6 }
  0x57   : > { %p1290_p5 = pnand %p1289_p3, %p1283_p1 }
  0x59   : > { %1293 = shalt.err (!%p1290_p5)
}
  0x5a   : > { %s1294_s18 = scalar_lea.vmem %s1614_s25, 512  ;;  %s1403_s22 = smov [#allocation2]  }
  0x5b   : > { %p1295_p9 = scmp.ne.s32.totalorder %s1614_s25, %s1294_s18  ;;  %s1299_s21 = sshll.u32 %s1403_s22, 4  ;;  %s1300_s21 = int_to_ptr.vmem [resolvable:$false] %s1299_s21 }
  0x5c   : > { %s1301_s27 = scalar_lea.vmem %s1300_s21, 1024  ;;  %p1302_p7 = scmp.lt.s32.totalorder %s1614_s25, %s1300_s21 }
  0x5d   : > { %p1297_p11 = pnand %p1295_p9, %p1281_p12  ;;  %p1303_p4 = scmp.lt.s32.totalorder %s1301_s27, %s1294_s18 }
  0x5f   : > { %p1298_p0 = pneg %p1297_p11  ;;  %p1304_p13 = por %p1303_p4, %p1302_p7 }
  0x61   : > { %p1305_p6 = pnand %p1304_p13, %p1298_p0 }
  0x63   : > { %1308 = shalt.err (!%p1305_p6)
}
  0x64   : > { %s1777_s20 = smov 256   ;;  %339 = sbr.rel (%p1510_p8) target bundleno = 870 (0x366), region = 48 }
  0x65   : > { %1147 = dma.hbm_to_vmem [thread:$0]  (!%p1610_p2), %s1606_s16, 512, %s1614_s25, %s1616_s11, %s1777_s20, %s1777_s20, %s1400_s24  }
  0x66   : > { %s1650_s8 = sand.u32 (!%p1510_p8), 1, %s1379_s28   ;;  %p1778_p7 = scmp.ne.s32.totalorder (!%p1510_p8), %s1770_s15, 0 }
  0x67   : > { %s963_s14 = sshll.u32 (!%p1510_p8), %s1650_s8, 5  ;;  %s342_s18 = scalar_lea.sflag (!%p1510_p8), [#allocation3], %s1650_s8 }
  0x68   : > { %s1654_s22 = scalar_lea.vmem (!%p1510_p8), [#allocation2], %s963_s14 }
  0x6b   : > { %1362 = dma.done.wait (%p1778_p7), %s342_s18, 512  }
  0x6c   : > { %1364 = vsyncadd (%p1778_p7), %s342_s18, 4294966784  ;;  %p1779_p2 = scmp.ne.s32.totalorder %s1768_s13, 0 }
  0x6e   : > { %1366 = dma.done.wait (%p1779_p2), [#allocation6], 12288  }
  0x6f   : > { %1368 = vsyncadd (%p1779_p2), [#allocation6], 4294955008  ;;  %v415_v0 = vld [vmem:[#allocation5 + $0x8] sm:$0xff]  ;;  %v417_v1 = vld [vmem:[#allocation5 + $0x18] sm:$0xff]  ;;  %p398_p8 = scmp.lt.s32.totalorder %s1387_s30, 1  ;;  %vm1405_vm0 = vmmov 0  }
  0x70   : > { %v414_v2 = vld [vmem:[#allocation5] sm:$0xff]  ;;  %v1026_v3 = vpack.c.bf16 %v417_v1, %v415_v0  ;;  %v416_v4 = vld [vmem:[#allocation5 + $0x10] sm:$0xff]  ;;  %v419_v5 = vld [vmem:[#allocation5 + $0x28] sm:$0xff]  ;;  %s966_s27 = sshll.u32 %s1650_s8, 4  ;;  %s779_s16 = scalar_lea.sflag [#allocation4], %s1650_s8 }
  0x71   : > { %v421_v6 = vld [vmem:[#allocation5 + $0x38] sm:$0xff]  ;;  %v1028_v7 = vpack.c.bf16 %v416_v4, %v414_v2  ;;  %v418_v9 = vld [vmem:[#allocation5 + $0x20] sm:$0xff]  ;;  %v420_v10 = vld [vmem:[#allocation5 + $0x30] sm:$0xff]  ;;  %s1670_s13 = scalar_select %p398_p8, %s1387_s30, 1 }
  0x72   : > { %v1030_v8 = vpack.c.bf16 %v421_v6, %v419_v5  ;;  %v423_v11 = vld [vmem:[#allocation5 + $0x48] sm:$0xff]  ;;  %1027 = vmatprep.subr.bf16.mxu0 %v1026_v3  ;;  %v425_v12 = vld [vmem:[#allocation5 + $0x58] sm:$0xff]  ;;  %v1032_v13 = vpack.c.bf16 %v420_v10, %v418_v9  ;;  %v422_v15 = vld [vmem:[#allocation5 + $0x40] sm:$0xff]  ;;  %s387_s20 = scalar_lea.vmem [#allocation8], %s966_s27  ;;  %p1780_p1 = scmp.ne.s32.totalorder %s1775_s12, 0 }
  0x73   : > { %1029 = vmatpush1.bf16.msra.mxu0 %v1028_v7  ;;  %v1034_v14 = vpack.c.bf16 %v425_v12, %v423_v11  ;;  %v424_v16 = vld [vmem:[#allocation5 + $0x50] sm:$0xff]  ;;  %v427_v17 = vld [vmem:[#allocation5 + $0x68] sm:$0xff]  ;;  %v429_v18 = vld [vmem:[#allocation5 + $0x78] sm:$0xff]  ;;  %s967_s15 = sshll.u32 %s1670_s13, 1  ;;  %s1408_s11 = smov [#allocation8]  }
  0x74   : > { %1031 = vmatprep.subr.bf16.mxu0 %v1030_v8  ;;  %v1036_v19 = vpack.c.bf16 %v424_v16, %v422_v15  ;;  %v1038_v20 = vpack.c.bf16 %v429_v18, %v427_v17  ;;  %v426_v21 = vld [vmem:[#allocation5 + $0x60] sm:$0xff]  ;;  %v428_v22 = vld [vmem:[#allocation5 + $0x70] sm:$0xff]  ;;  %v431_v23 = vld [vmem:[#allocation5 + $0x88] sm:$0xff]  ;;  %s401_s24 = scalar_lea.vmem %s1751_s1, %s967_s15  ;;  %s977_s15 = sshll.u32 %s1387_s30, 8 }
  0x75   : > { %v433_v24 = vld [vmem:[#allocation5 + $0x98] sm:$0xff]  ;;  %v1040_v25 = vpack.c.bf16 %v428_v22, %v426_v21  ;;  %v430_v27 = vld [vmem:[#allocation5 + $0x80] sm:$0xff]  ;;  %v432_v28 = vld [vmem:[#allocation5 + $0x90] sm:$0xff]  ;;  %s1313_s21 = sshll.u32 %s1408_s11, 4  ;;  %s1314_s21 = int_to_ptr.vmem [resolvable:$false] %s1313_s21 }
  0x76   : > { %v1042_v26 = vpack.c.bf16 %v433_v24, %v431_v23  ;;  %v435_v29 = vld [vmem:[#allocation5 + $0xa8] sm:$0xff]  ;;  %v437_v30 = vld [vmem:[#allocation5 + $0xb8] sm:$0xff]  ;;  %v1044_v31 = vpack.c.bf16 %v432_v28, %v430_v27  ;;  %v434_v33 = vld [vmem:[#allocation5 + $0xa0] sm:$0xff]  ;;  %s1315_s27 = scalar_lea.vmem %s1314_s21, 512 }
  0x77   : > { %1033 = vmatpush1.bf16.msra.mxu0 %v1032_v13  ;;  %v1046_v32 = vpack.c.bf16 %v437_v30, %v435_v29  ;;  %v436_v34 = vld [vmem:[#allocation5 + $0xb0] sm:$0xff]  ;;  %v439_v35 = vld [vmem:[#allocation5 + $0xc8] sm:$0xff]  ;;  %v441_v36 = vld [vmem:[#allocation5 + $0xd8] sm:$0xff] }
  0x78   : > { %1035 = vmatprep.subr.bf16.mxu0 %v1034_v14  ;;  %v1048_v37 = vpack.c.bf16 %v436_v34, %v434_v33  ;;  %v1050_v38 = vpack.c.bf16 %v441_v36, %v439_v35  ;;  %v438_v39 = vld [vmem:[#allocation5 + $0xc0] sm:$0xff]  ;;  %v440_v40 = vld [vmem:[#allocation5 + $0xd0] sm:$0xff]  ;;  %v411_v41 = vld [vmem:[%s1654_s22 + $0x8] sm:$0xff] }
  0x79   : > { %v443_v42 = vld [vmem:[#allocation5 + $0xe8] sm:$0xff]  ;;  %v445_v43 = vld [vmem:[#allocation5 + $0xf8] sm:$0xff]  ;;  %554 = vmatprep.mubr.f32.mxu0 %v411_v41  ;;  %v587_v44 = vld [vmem:[#allocation7 + $0x80] sm:$0xff]  ;;  %v1052_v50 = vpack.c.bf16 %v440_v40, %v438_v39 }
  0x7a   : > { %v442_v45 = vld [vmem:[#allocation5 + $0xe0] sm:$0xff]  ;;  %v444_v46 = vld [vmem:[#allocation5 + $0xf0] sm:$0xff]  ;;  %v588_v47 = vld [vmem:[#allocation7 + $0x88] sm:$0xff]  ;;  %v1054_v56 = vpack.c.bf16 %v445_v43, %v443_v42 }
  0x7b   : > { %1037 = vmatpush1.bf16.msra.mxu0 %v1036_v19  ;;  %v571_v48 = vld [vmem:[#allocation7] sm:$0xff]  ;;  %v572_v49 = vld [vmem:[#allocation7 + $0x8] sm:$0xff]  ;;  %v1090_v51 = vpack.c.bf16 %v588_v47, %v587_v44  ;;  %v589_v53 = vld [vmem:[#allocation7 + $0x90] sm:$0xff]  ;;  %v1056_v0 = vpack.c.bf16 %v444_v46, %v442_v45 }
  0x7c   : > { %1039 = vmatprep.subr.bf16.mxu0 %v1038_v20  ;;  %v1092_v52 = vpack.c.bf16 %v572_v49, %v571_v48  ;;  %v590_v54 = vld [vmem:[#allocation7 + $0x98] sm:$0xff]  ;;  %v573_v55 = vld [vmem:[#allocation7 + $0x10] sm:$0xff]  ;;  %v591_v59 = vld [vmem:[#allocation7 + $0xa0] sm:$0xff] }
  0x7d   : > { %v1094_v57 = vpack.c.bf16 %v590_v54, %v589_v53  ;;  %v574_v58 = vld [vmem:[#allocation7 + $0x18] sm:$0xff]  ;;  %v592_v60 = vld [vmem:[#allocation7 + $0xa8] sm:$0xff]  ;;  %1091 = vmatprep.subr.bf16.mxu1 %v1090_v51  ;;  %v446_v1 = vld [vmem:[#allocation5 + $0x100] sm:$0xff] }
  0x7e   : > { %v447_v61 = vld [vmem:[#allocation5 + $0x108] sm:$0xff]  ;;  %v449_v62 = vld [vmem:[#allocation5 + $0x118] sm:$0xff]  ;;  %1093 = vmatpush3.bf16.msra.mxu1 %v1092_v52  ;;  %v1096_v63 = vpack.c.bf16 %v574_v58, %v573_v55  ;;  %v1098_v2 = vpack.c.bf16 %v592_v60, %v591_v59  ;;  %v575_v3 = vld [vmem:[#allocation7 + $0x20] sm:$0xff] }
  0x7f   : > { %1041 = vmatpush1.bf16.msra.mxu0 %v1040_v25  ;;  %1095 = vmatprep.subr.bf16.mxu1 %v1094_v57  ;;  %v576_v4 = vld [vmem:[#allocation7 + $0x28] sm:$0xff]  ;;  %v1058_v5 = vpack.c.bf16 %v449_v62, %v447_v61  ;;  %v448_v6 = vld [vmem:[#allocation5 + $0x110] sm:$0xff]  ;;  %v594_v8 = vld [vmem:[#allocation7 + $0xb8] sm:$0xff] }
  0x80   : > { %1043 = vmatprep.subr.bf16.mxu0 %v1042_v26  ;;  %v593_v7 = vld [vmem:[#allocation7 + $0xb0] sm:$0xff]  ;;  %v451_v9 = vld [vmem:[#allocation5 + $0x128] sm:$0xff]  ;;  %v453_v10 = vld [vmem:[#allocation5 + $0x138] sm:$0xff]  ;;  %v1100_v11 = vpack.c.bf16 %v576_v4, %v575_v3  ;;  %v1060_v12 = vpack.c.bf16 %v448_v6, %v446_v1 }
  0x81   : > { %v450_v13 = vld [vmem:[#allocation5 + $0x120] sm:$0xff]  ;;  %v1102_v14 = vpack.c.bf16 %v594_v8, %v593_v7  ;;  %v577_v15 = vld [vmem:[#allocation7 + $0x30] sm:$0xff]  ;;  %v578_v16 = vld [vmem:[#allocation7 + $0x38] sm:$0xff]  ;;  %v1062_v17 = vpack.c.bf16 %v453_v10, %v451_v9 }
  0x82   : > { %1097 = vmatpush3.bf16.msra.mxu1 %v1096_v63  ;;  %v452_v18 = vld [vmem:[#allocation5 + $0x130] sm:$0xff]  ;;  %v595_v19 = vld [vmem:[#allocation7 + $0xc0] sm:$0xff]  ;;  %v596_v20 = vld [vmem:[#allocation7 + $0xc8] sm:$0xff]  ;;  %v1104_v23 = vpack.c.bf16 %v578_v16, %v577_v15 }
  0x83   : > { %1045 = vmatpush1.bf16.msra.mxu0 %v1044_v31  ;;  %1099 = vmatprep.subr.bf16.mxu1 %v1098_v2  ;;  %v455_v21 = vld [vmem:[#allocation5 + $0x148] sm:$0xff]  ;;  %v457_v22 = vld [vmem:[#allocation5 + $0x158] sm:$0xff]  ;;  %v1064_v24 = vpack.c.bf16 %v452_v18, %v450_v13  ;;  %v454_v25 = vld [vmem:[#allocation5 + $0x140] sm:$0xff]  ;;  %v1106_v26 = vpack.c.bf16 %v596_v20, %v595_v19  ;;  %v480_v20 = vlaneseq }
  0x84   : > { %1047 = vmatprep.subr.bf16.mxu0 %v1046_v32  ;;  %v579_v27 = vld [vmem:[#allocation7 + $0x40] sm:$0xff]  ;;  %v580_v28 = vld [vmem:[#allocation7 + $0x48] sm:$0xff]  ;;  %v1066_v29 = vpack.c.bf16 %v457_v22, %v455_v21  ;;  %v456_v30 = vld [vmem:[#allocation5 + $0x150] sm:$0xff] }
  0x85   : > { %v597_v31 = vld [vmem:[#allocation7 + $0xd0] sm:$0xff]  ;;  %v598_v32 = vld [vmem:[#allocation7 + $0xd8] sm:$0xff]  ;;  %v459_v33 = vld [vmem:[#allocation5 + $0x168] sm:$0xff]  ;;  %v1108_v35 = vpack.c.bf16 %v580_v28, %v579_v27  ;;  %v1068_v36 = vpack.c.bf16 %v456_v30, %v454_v25  ;;  %v1673_v21 = vshrl.u32 %v480_v20, 7 }
  0x86   : > { %1101 = vmatpush3.bf16.msra.mxu1 %v1100_v11  ;;  %v461_v34 = vld [vmem:[#allocation5 + $0x178] sm:$0xff]  ;;  %v581_v39 = vld [vmem:[#allocation7 + $0x50] sm:$0xff]  ;;  %v599_v43 = vld [vmem:[#allocation7 + $0xe0] sm:$0xff] }
  0x87   : > { %1049 = vmatpush1.bf16.msra.mxu0 %v1048_v37  ;;  %1103 = vmatprep.subr.bf16.mxu1 %v1102_v14  ;;  %v458_v37 = vld [vmem:[#allocation5 + $0x160] sm:$0xff]  ;;  %v582_v40 = vld [vmem:[#allocation7 + $0x58] sm:$0xff]  ;;  %v1070_v41 = vpack.c.bf16 %v461_v34, %v459_v33  ;;  %v460_v42 = vld [vmem:[#allocation5 + $0x170] sm:$0xff]  ;;  %v482_v22 = vsub.s32 0, %v1673_v21 }
  0x88   : > { %1051 = vmatprep.subr.bf16.mxu0 %v1050_v38  ;;  %v1110_v38 = vpack.c.bf16 %v598_v32, %v597_v31  ;;  %v600_v44 = vld [vmem:[#allocation7 + $0xe8] sm:$0xff]  ;;  %v465_v46 = vld [vmem:[#allocation5 + $0x198] sm:$0xff]  ;;  %v1112_v47 = vpack.c.bf16 %v582_v40, %v581_v39  ;;  %v1072_v48 = vpack.c.bf16 %v460_v42, %v458_v37  ;;  %v462_v51 = vld [vmem:[#allocation5 + $0x180] sm:$0xff]  ;;  %v1404_v39 = vmov 0.0|0.0  }
  0x89   : > { %v463_v45 = vld [vmem:[#allocation5 + $0x188] sm:$0xff]  ;;  %v1114_v49 = vpack.c.bf16 %v600_v44, %v599_v43  ;;  %v464_v52 = vld [vmem:[#allocation5 + $0x190] sm:$0xff]  ;;  %v469_v54 = vld [vmem:[#allocation5 + $0x1b8] sm:$0xff]  ;;  %v1406_v40 = vmov 0.0   ;;  %v1407_v42 = vmov 0  }
  0x8a   : > { %1105 = vmatpush3.bf16.msra.mxu1 %v1104_v23  ;;  %v467_v53 = vld [vmem:[#allocation5 + $0x1a8] sm:$0xff]  ;;  %v1076_v55 = vpack.c.bf16 %v464_v52, %v462_v51  ;;  %v466_v57 = vld [vmem:[#allocation5 + $0x1a0] sm:$0xff]  ;;  %v468_v58 = vld [vmem:[#allocation5 + $0x1b0] sm:$0xff]  ;;  %1218 = vset.pattern.permute.xlu0 %v1407_v42 }
  0x8b   : > { %1053 = vmatpush1.bf16.msra.mxu0 %v1052_v50  ;;  %1107 = vmatprep.subr.bf16.mxu1 %v1106_v26  ;;  %v1074_v50 = vpack.c.bf16 %v465_v46, %v463_v45  ;;  %v471_v59 = vld [vmem:[#allocation5 + $0x1c8] sm:$0xff]  ;;  %v473_v60 = vld [vmem:[#allocation5 + $0x1d8] sm:$0xff]  ;;  %v1080_v61 = vpack.c.bf16 %v468_v58, %v466_v57  ;;  %v470_v63 = vld [vmem:[#allocation5 + $0x1c0] sm:$0xff] }
  0x8c   : > { %1055 = vmatprep.subr.bf16.mxu0 %v1054_v56  ;;  %v1078_v56 = vpack.c.bf16 %v469_v54, %v467_v53  ;;  %v1082_v62 = vpack.c.bf16 %v473_v60, %v471_v59  ;;  %v475_v1 = vld [vmem:[#allocation5 + $0x1e8] sm:$0xff]  ;;  %v477_v2 = vld [vmem:[#allocation5 + $0x1f8] sm:$0xff]  ;;  %v476_v6 = vld [vmem:[#allocation5 + $0x1f0] sm:$0xff] }
  0x8d   : > { %v1086_v4 = vpack.c.bf16 %v477_v2, %v475_v1  ;;  %v410_v8 = vld [vmem:[%s1654_s22] sm:$0xff]  ;;  %v413_v9 = vld [vmem:[%s1654_s22 + $0x18] sm:$0xff]  ;;  %v412_v10 = vld [vmem:[%s1654_s22 + $0x10] sm:$0xff]  ;;  %s801_s22 = sshll.u32 %s387_s20, 4  ;;  %s1690_s22 = int_to_ptr.vmem [resolvable:$true] %s801_s22 }
  0x8e   : > { %1109 = vmatpush3.bf16.msra.mxu1 %v1108_v35  ;;  %v583_v11 = vld [vmem:[#allocation7 + $0x60] sm:$0xff]  ;;  %v601_v14 = vld [vmem:[#allocation7 + $0xf0] sm:$0xff]  ;;  %v602_v15 = vld [vmem:[#allocation7 + $0xf8] sm:$0xff]  ;;  %s1309_s25 = scalar_lea.vmem %s1690_s22, 256  ;;  %p1316_p5 = scmp.lt.s32.totalorder %s1690_s22, %s1314_s21 }
  0x8f   : > { %1057 = vmatpush1.bf16.msra.mxu0 %v1056_v0  ;;  %1111 = vmatprep.subr.bf16.mxu1 %v1110_v38  ;;  %v472_v0 = vld [vmem:[#allocation5 + $0x1d0] sm:$0xff]  ;;  %v1118_v16 = vpack.c.bf16 %v602_v15, %v601_v14  ;;  %v586_v18 = vld [vmem:[#allocation7 + $0x78] sm:$0xff]  ;;  %v478_v23 = vld [vmem:[%s401_s24] sm:$0x3]  ;;  %s1696_s24 = scalar_lea.hbm %s1757_s7, %s977_s15  ;;  %p1310_p12 = scmp.ne.s32.totalorder %s1690_s22, %s1309_s25 }
  0x90   : > { %1059 = vmatprep.subr.bf16.mxu0 %v1058_v5  ;;  %v1084_v3 = vpack.c.bf16 %v472_v0, %v470_v63  ;;  %v474_v5 = vld [vmem:[#allocation5 + $0x1e0] sm:$0xff]  ;;  %v483_v25 = vrot.slane %v478_v23, %v482_v22  ;;  %p1317_p9 = scmp.lt.s32.totalorder %s1315_s27, %s1309_s25 }
  0x91   : > { %v1088_v7 = vpack.c.bf16 %v476_v6, %v474_v5  ;;  %v969_v44 = vld [vmem:[%s1754_s4] ss:$0 sm:$0xff]  ;;  %p1311_p10 = pnand %p1310_p12, %p1780_p1 }
  0x92   : > { %1113 = vmatpush3.bf16.msra.mxu1 %v1112_v47  ;;  %p1318_p11 = por %p1317_p9, %p1316_p5 }
  0x93   : > { %1061 = vmatpush1.bf16.msra.mxu0 %v1060_v12  ;;  %1115 = vmatprep.subr.bf16.mxu1 %v1114_v49  ;;  %v584_v12 = vld [vmem:[#allocation7 + $0x68] sm:$0xff]  ;;  %p1312_p3 = pneg %p1311_p10 }
  0x94   : > { %1063 = vmatprep.subr.bf16.mxu0 %v1062_v17  ;;  %v1116_v13 = vpack.c.bf16 %v584_v12, %v583_v11  ;;  %v585_v17 = vld [vmem:[#allocation7 + $0x70] sm:$0xff] }
  0x95   : > { %v1120_v19 = vpack.c.bf16 %v586_v18, %v585_v17  ;;  %p1319_p0 = pnand %p1318_p11, %p1312_p3 }
  0x96   : > { %1117 = vmatpush3.bf16.msra.mxu1 %v1116_v13 }
  0x97   : > { %1065 = vmatpush1.bf16.msra.mxu0 %v1064_v24  ;;  %1119 = vmatprep.subr.bf16.mxu1 %v1118_v16  ;;  %v486_v24 = vsub.s32 1, %v1673_v21 }
  0x98   : > { %1067 = vmatprep.subr.bf16.mxu0 %v1066_v29 }
  0x99   : > { %v487_v26 = vrot.slane %v478_v23, %v486_v24 }
  0x9a   : > { %1121 = vmatpush3.bf16.msra.mxu1 %v1120_v19 }
  0x9b   : > { %1069 = vmatpush1.bf16.msra.mxu0 %v1068_v36  ;;  %1122 = vmatprep.subr.bf16.mxu1 %v1404_v39 }
  0x9c   : > { %1071 = vmatprep.subr.bf16.mxu0 %v1070_v41  ;;  %v690_v41 = vld [vmem:[%s1756_s6] sm:$0x7] }
  0x9d   : > { %693 = vperm.xlu0 %1218, %v690_v41  }
  0x9f   : > { %1073 = vmatpush1.bf16.msra.mxu0 %v1072_v48 }
  0xa0   : > { %1075 = vmatprep.subr.bf16.mxu0 %v1074_v50 }
  0xa3   : > { %1077 = vmatpush1.bf16.msra.mxu0 %v1076_v55  ;;  %v689_v55 = vld [vmem:[%s1755_s5] sm:$0x7] }
  0xa4   : > { %1079 = vmatprep.subr.bf16.mxu0 %v1078_v56 }
  0xa7   : > { %1081 = vmatpush1.bf16.msra.mxu0 %v1080_v61 }
  0xa8   : > { %1083 = vmatprep.subr.bf16.mxu0 %v1082_v62 }
  0xab   : > { %1085 = vmatpush1.bf16.msra.mxu0 %v1084_v3 }
  0xac   : > { %1087 = vmatprep.subr.bf16.mxu0 %v1086_v4 }
  0xaf   : > { %1089 = vmatpush1.bf16.msra.mxu0 %v1088_v7 }
  0xb2   : > { %555 = vmatmul.mubr.f32.vlgmr.msra.gmra.mrb[0].mxu0 %v410_v8 }
  0xb3   : > { %560 = vmatprep.mubr.f32.mxu0 %v413_v9 }
  0xb6   : > { %561 = vmatmul.mubr.f32.gmra.mrb[2].mxu0 %v412_v10 }
 0x185   : > { %v556_v27 = vpop.f32.mrb[0].mxu0 }
 0x186   : > { %v557_v28 = vadd.f32 %v556_v27, %v483_v25  ;;  %v558_v29 = vpop.f32.mrb[1].mxu0 }
 0x187   : > { %v559_v30 = vadd.f32 %v558_v29, %v487_v26 }
 0x188   : > { %v567_v33 = vmax.f32 %v557_v28, 0.0 }
 0x189   : > { %v562_v31 = vpop.f32.mrb[2].mxu0  ;;  %v568_v32 = vmax.f32 %v559_v30, 0.0 }
 0x18a   : > { %v563_v34 = vadd.f32 %v562_v31, %v483_v25  ;;  %v564_v35 = vpop.f32.mrb[3].mxu0 }
 0x18b   : > { %v565_v36 = vadd.f32 %v564_v35, %v487_v26  ;;  %674 = vmatprep.mubr.f32.mxu1 %v568_v32 }
 0x18c   : > { %675 = vmatmul.mubr.f32.vlgmr.msra.gmra.mrb[0].mxu1 %v567_v33  ;;  %v569_v38 = vmax.f32 %v563_v34, 0.0 }
 0x18d   : > { %v570_v37 = vmax.f32 %v565_v36, 0.0 }
 0x18f   : > { %679 = vmatprep.mubr.f32.mxu1 %v570_v37 }
 0x190   : > { %680 = vmatmul.mubr.f32.gmra.mrb[2].mxu1 %v569_v38 }
 0x191   : > { %1023 = vmatprep.mubr.msk.f32.mxu1 %vm1405_vm0, %v1406_v40 }
 0x25f   : > { %v1010_v43 = vpop.f32.mrb[0].mxu1 }
 0x260   : > { %v1011_v45 = vpop.f32.mrb[1].mxu1 }
 0x261   : > { %v1012_v46 = vadd.f32 %v1011_v45, %v1010_v43 }
 0x263   : > { %v677_v47 = vadd.f32 %v1012_v46, %v969_v44  ;;  %v1013_v48 = vpop.f32.mrb[2].mxu1 }
 0x264   : > { %v1014_v49 = vpop.f32.mrb[3].mxu1 }
 0x265   : > { %v685_v50 = vmax.f32 %v677_v47, 0.0  ;;  %v1015_v51 = vadd.f32 %v1014_v49, %v1013_v48 }
 0x267   : > { %687 = vst [vmem:[%s387_s20] sm:$0xff] %v685_v50  ;;  %v682_v52 = vadd.f32 %v1015_v51, %v969_v44 }
 0x269   : > { %v686_v53 = vmax.f32 %v682_v52, 0.0 }
 0x26b   : > { %688 = vst [vmem:[%s387_s20 + $0x8] sm:$0xff] %v686_v53  ;;  %v1123_v54 = vpack.c.bf16 %v686_v53, %v685_v50 }
 0x26d   : > { %1124 = vmatpush3.bf16.xpose.msra.mxu1 %v1123_v54 }
 0x274   : > { %1024 = vmatmul.mubr.f32.vlgmr.msra.gmra.mrb[4].mxu1 %v689_v55 }
 0x275   : > { %1322 = shalt.err (!%p1319_p0)
}
 0x276   : > { %s1323_s30 = scalar_lea.hbm %s1696_s24, 256  ;;  %s1327_s18 = scalar_lea.hbm %s1757_s7, 512 }
 0x277   : > { %p1324_p4 = scmp.ne.s32.totalorder %s1696_s24, %s1323_s30  ;;  %p1328_p7 = scmp.lt.u32.totalorder %s1696_s24, %s1757_s7 }
 0x278   : > { %p1329_p2 = scmp.lt.u32.totalorder %s1327_s18, %s1323_s30  ;;  %p1331_p12 = scmp.lt.u32.totalorder %s1323_s30, %s1696_s24 }
 0x279   : > { %p1325_p13 = pnand %p1324_p4, %p1780_p1 }
 0x27a   : > { %p1330_p8 = por %p1329_p2, %p1328_p7 }
 0x27b   : > { %p1326_p6 = pneg %p1325_p13 }
 0x27c   : > { %p1332_p10 = por %p1331_p12, %p1330_p8 }
 0x27e   : > { %p1333_p3 = pnand %p1332_p10, %p1326_p6 }
 0x280   : > { %1336 = shalt.err (!%p1333_p3)
}
 0x281   : > { %s1409_s23 = smov 128   ;;  %s1410_s25 = smov 8   ;;  %v694_v56 = vpop.permute.xlu0 %693  ;;  %vm768_vm1 = vcmp.eq.s32.totalorder %v1673_v21, 2  ;;  %vm776_vm2 = vcmask 124928  }
 0x282   : > { %1135 = dma.vmem_to_hbm [thread:$0]  (%p1780_p1), %s1690_s22, 256, %s1696_s24, %s779_s16, %s1409_s23, %s1409_s23, %s1410_s25  }
 0x283   : > { %s968_s11 = sshll.u32 %s1670_s13, 2  ;;  %s1781_s30 = sld [smem:[#allocation14_spill]] }
 0x289   : > { %s409_s20 = scalar_lea.vmem %s1781_s30, %s968_s11 }
 0x347   : > { %v762_v57 = vpop.f32.mrb[4].mxu1 }
 0x348   : > { %v763_v58 = vadd.f32 %v762_v57, %v694_v56  ;;  %v1025_v59 = vpop.f32.mrb[5].mxu1 }
 0x34a   : > { %v970_v60 = vmul.f32 -1.442695, %v763_v58 }
 0x34c   : > { %1219 = vpow2.f32 %v970_v60 }
 0x356   : > { %v1220_v61 = vpop.eup %1219 }
 0x357   : > { %v772_v62 = vadd.f32 1.0, %v1220_v61 }
 0x359   : > { %1221 = vrcp.f32 %v772_v62 }
 0x363   : > { %v1222_v63 = vpop.eup %1221 }
 0x364   : > { %v775_v0 = vsel %vm768_vm1, %v1222_v63, %v763_v58 }
 0x365   : > { %777 = vst.msk [vmem:[%s409_s20] sm:$0x7] %vm776_vm2, %v775_v0 }
 0x366 PF: > { %s1782_s12 = sld [smem:[#allocation12_spill]]  ;;  %s1783_s8 = sld [smem:[#allocation13_spill]] }
 0x367   : > { %p1785_p5 = scmp.ge.s32.totalorder %s1395_s10, 2 }
 0x36c   : > { %s819_s22 = sand.u32 1, %s1782_s12   ;;  %p1784_p1 = scmp.ne.s32.totalorder %s1783_s8, 0 }
 0x36d   : > { %s820_s24 = scalar_lea.sflag [#allocation4], %s819_s22 }
 0x36e   : > { %p1149_p9 = pnand %p1785_p5, %p1784_p1 }
 0x370   : > { %1370 = dma.done.wait (!%p1149_p9), %s820_s24, 256  }
 0x371   : > { %1372 = vsyncadd (!%p1149_p9), %s820_s24, 4294967040  ;;  %s26_s10 = sadd.s32 1, %s1395_s10   ;;  %s1786_s27 = smov %s1379_s28 }
 0x372   : > { %p23_p11 = scmp.ge.s32.totalorder %s26_s10, 4   ;;  %s1787_s28 = smov %s1383_s29 }
 0x373   : > { %s1788_s29 = smov %s1601_s19  ;;  %s1789_s30 = smov %s1391_s9 }
 0x374   : > { %s1790_s9 = smov %s1792_s26  ;;  %25 = sbr.rel (!%p23_p11) target bundleno = 9 (0x9), region = 116 }
 0x37b   :  { %835 = vsyncpa [#allocation3], 1 }
 0x37c   :  { %837 = vsyncpa [#allocation3 + $0x1], 1 }
 0x37d   :  { %838 = vsyncpa [#allocation6], 1 }
 0x37e   :  { %839 = vsyncpa [#allocation4], 1 }
 0x37f   :  { %841 = vsyncpa [#allocation4 + $0x1], 1 }

</bundles_post_ra>
